<compile_context>
chip_gen: v7x
topology: tpu7x:2x2x1
jax: 0.10.0
libtpu: 0.0.40
codegen_flags: <defaults>
</compile_context>

<pallas_src>
import functools

import jax
import jax.numpy as jnp
from jax.experimental import pallas as pl
from jax.experimental.pallas import tpu as pltpu


def _dgm_cell_kernel(sp_ref, x_ref, s_ref, u_ref, w_ref, wh_ref, b_ref,
                     s_out_ref, *, growing):
    m = s_ref.shape[-1]
    beta = sp_ref[0, 0]          # exp(log_beta)
    inv_beta = sp_ref[0, 1]      # exp(-log_beta)  (precomputed: no vector divide)

    mm_dtype = u_ref.dtype                       # f32 or bf16 matmul operands
    x = x_ref[...].astype(mm_dtype)              # (tile_n, d)
    s_f32 = s_ref[...].astype(jnp.float32)       # (tile_n, M)
    s_mm = s_ref[...].astype(mm_dtype)

    # One wide X matmul + one wide S matmul; f32 accumulation on the MXU.
    pre = jnp.dot(x, u_ref[...], preferred_element_type=jnp.float32)       # (tile_n, 4M)
    pre = pre + jnp.dot(s_mm, w_ref[...], preferred_element_type=jnp.float32)
    pre = pre + b_ref[...].astype(jnp.float32)   # fused [bz|bg|br|bh] bias

    def learned_softplus(v):                     # LearnedSoftPlus (threshold 20)
        bv = beta * v
        return jnp.where(bv < 20.0, jnp.log1p(jnp.exp(bv)) * inv_beta, v)

    z = learned_softplus(pre[:, 0 * m:1 * m])
    g = learned_softplus(pre[:, 1 * m:2 * m])
    r = learned_softplus(pre[:, 2 * m:3 * m])

    h = pre[:, 3 * m:4 * m] + jnp.dot((s_f32 * r).astype(mm_dtype), wh_ref[...],
                                      preferred_element_type=jnp.float32)
    if not growing:                              # A = identity if growing else sigma
        h = learned_softplus(h)

    s_out_ref[...] = ((1.0 - g) * h + z * s_f32).astype(s_out_ref.dtype)


def _vmem_capacity_bytes():
    # Per-generation physical VMEM (128 MiB v5e/v6e, 64 MiB per core on v7x).
    try:
        return int(pltpu.get_tpu_info().vmem_capacity_bytes)
    except Exception:
        return 64 * 1024 * 1024  # conservative default (v7x per-core)


def _pick_tile_n(n, d, m, in_itemsize, out_itemsize, row_budget_bytes):
    # Double-buffered x/s input tiles + double-buffered output tile + a generous
    # allowance for the f32 in-kernel intermediates (pre, z/g/r/h, s*r, ...).
    per_row = (2 * (d + m) * in_itemsize
               + 2 * m * out_itemsize
               + (16 * m + 2 * d) * 4)
    cap = max(8, row_budget_bytes // max(per_row, 1))
    tile = 8
    for t in (2048, 1024, 512, 256, 128, 64, 32, 16, 8):
        if t <= cap:
            tile = t
            break
    if n < tile:           # full-extent block is always legal for small N
        tile = n
    return tile


def prepare_dgm_params(Uz, Ug, Ur, Uh, Wz, Wg, Wr, Wh, bz, bg, br, bh,
                       log_beta, matmul_dtype=None):
    """One-time weight prep (hoist out of any per-timestep loop).

    torch nn.Linear stores (out, in); transpose once and concat into lane-dense
    fused matrices.  Pass matmul_dtype=jnp.bfloat16 for MXU-native throughput
    (activation/gating math stays f32 in-kernel).
    # TODO(synk): weight-norm (WN) reparameterization has no separate kernel; pass the
    # materialized effective weights (g * v / ||v||) here — the forward math is identical.
    """
    M, d = Uz.shape
    wdt = jnp.dtype(matmul_dtype) if matmul_dtype is not None else jnp.dtype(Uz.dtype)

    u_fused = jnp.concatenate([Uz.T, Ug.T, Ur.T, Uh.T], axis=1).astype(wdt)        # (d, 4M)
    w_fused = jnp.concatenate([Wz.T, Wg.T, Wr.T,
                               jnp.zeros((M, M), Wz.dtype)], axis=1).astype(wdt)   # (M, 4M)
    wh_t = Wh.T.astype(wdt)                                                        # (M, M)
    b_fused = jnp.concatenate([bz, bg, br, bh]).reshape(1, 4 * M).astype(jnp.float32)

    beta = jnp.exp(log_beta).astype(jnp.float32)
    inv_beta = jnp.exp(-log_beta).astype(jnp.float32)
    sp_params = jnp.stack([beta, inv_beta]).reshape(1, 2)
    return u_fused, w_fused, wh_t, b_fused, sp_params


@functools.partial(jax.jit, static_argnames=("growing",))
def dgm_cell_forward_prepared(S, X, u_fused, w_fused, wh_t, b_fused, sp_params,
                              growing=False):
    """Pallas DGMCell.forward((S, X)) -> (S_new, X) using prepared params."""
    *lead, M = S.shape
    d = X.shape[-1]
    N = 1
    for dim in lead:
        N *= dim

    x2d = X.reshape(N, d)
    s2d = S.reshape(N, M)

    in_itemsize = max(jnp.dtype(X.dtype).itemsize, jnp.dtype(S.dtype).itemsize)
    out_itemsize = jnp.dtype(S.dtype).itemsize
    w_itemsize = jnp.dtype(u_fused.dtype).itemsize

    # Resident weight/bias footprint (pipeline double-buffers every input block).
    weight_bytes = ((u_fused.size + w_fused.size + wh_t.size) * w_itemsize
                    + b_fused.size * 4)
    # TODO(synk): for very large M (resident weights > ~40 MiB) switch to streaming
    # W column slabs over an extra grid axis instead of pinning everything.
    vmem_capacity = _vmem_capacity_bytes()
    vmem_limit = (vmem_capacity * 3) // 4                    # ~96 MiB v5e/v6e, ~48 MiB v7x
    row_budget = max(4 * 1024 * 1024,
                     vmem_limit - 2 * weight_bytes - 4 * 1024 * 1024)

    tile_n = _pick_tile_n(N, d, M, in_itemsize, out_itemsize, row_budget)
    grid = (pl.cdiv(N, tile_n),)

    def row_spec(cols):
        return pl.BlockSpec((tile_n, cols), lambda i: (i, 0))

    def pinned(shape):
        # Constant index_map -> block stays resident in VMEM across grid steps.
        return pl.BlockSpec(shape, lambda i: (0, 0))

    flops = 2 * N * M * (4 * d + 5 * M) + 12 * N * M
    transcendentals = (3 if growing else 4) * 2 * N * M
    bytes_accessed = (N * (d * in_itemsize + 2 * M * out_itemsize) + weight_bytes)

    kernel = functools.partial(_dgm_cell_kernel, growing=growing)

    s_new_2d = pl.pallas_call(
        kernel,
        out_shape=jax.ShapeDtypeStruct((N, M), S.dtype),
        grid=grid,
        in_specs=[
            pl.BlockSpec(memory_space=pltpu.MemorySpace.SMEM),   # [beta, inv_beta]
            row_spec(d),                                         # X row tile
            row_spec(M),                                         # S row tile
            pinned((d, 4 * M)),                                  # [Uz|Ug|Ur|Uh]^T
            pinned((M, 4 * M)),                                  # [Wz|Wg|Wr|0]^T
            pinned((M, M)),                                      # Wh^T
            pinned((1, 4 * M)),                                  # [bz|bg|br|bh]
        ],
        out_specs=row_spec(M),
        compiler_params=pltpu.CompilerParams(
            dimension_semantics=("parallel",),
            vmem_limit_bytes=int(vmem_limit)),
        cost_estimate=pl.CostEstimate(
            flops=int(flops),
            transcendentals=int(transcendentals),
            bytes_accessed=int(bytes_accessed)),
    )(sp_params, x2d, s2d, u_fused, w_fused, wh_t, b_fused)

    S_new = s_new_2d.reshape(*lead, M)
    return S_new, X


def dgm_cell_forward(S, X, Uz, Ug, Ur, Uh, Wz, Wg, Wr, Wh,
                     bz, bg, br, bh, log_beta, growing=False, matmul_dtype=None):
    """Convenience wrapper: prep + forward.  For recurrent use, call
    prepare_dgm_params() once and dgm_cell_forward_prepared() per step."""
    params = prepare_dgm_params(Uz, Ug, Ur, Uh, Wz, Wg, Wr, Wh,
                                bz, bg, br, bh, log_beta, matmul_dtype=matmul_dtype)
    return dgm_cell_forward_prepared(S, X, *params, growing=growing)


if __name__ == "__main__":
    # Small deterministic setup consistent with DGMCell(d, M): batch=2, seq=8, d=32, M=32.
    batch, seq, d, M = 2, 8, 32, 32
    growing = False

    key = jax.random.PRNGKey(0)
    keys = jax.random.split(key, 14)

    X = jax.random.normal(keys[0], (batch, seq, d), dtype=jnp.float32)
    S = jax.random.normal(keys[1], (batch, seq, M), dtype=jnp.float32)

    # Deterministic init mimicking torch nn.Linear default (uniform +/- 1/sqrt(fan_in)).
    bu = 1.0 / (d ** 0.5)
    bw = 1.0 / (M ** 0.5)
    Uz = jax.random.uniform(keys[2], (M, d), minval=-bu, maxval=bu, dtype=jnp.float32)
    Ug = jax.random.uniform(keys[3], (M, d), minval=-bu, maxval=bu, dtype=jnp.float32)
    Ur = jax.random.uniform(keys[4], (M, d), minval=-bu, maxval=bu, dtype=jnp.float32)
    Uh = jax.random.uniform(keys[5], (M, d), minval=-bu, maxval=bu, dtype=jnp.float32)
    Wz = jax.random.uniform(keys[6], (M, M), minval=-bw, maxval=bw, dtype=jnp.float32)
    Wg = jax.random.uniform(keys[7], (M, M), minval=-bw, maxval=bw, dtype=jnp.float32)
    Wr = jax.random.uniform(keys[8], (M, M), minval=-bw, maxval=bw, dtype=jnp.float32)
    Wh = jax.random.uniform(keys[9], (M, M), minval=-bw, maxval=bw, dtype=jnp.float32)
    bz = jax.random.uniform(keys[10], (M,), minval=-bw, maxval=bw, dtype=jnp.float32)
    bg = jax.random.uniform(keys[11], (M,), minval=-bw, maxval=bw, dtype=jnp.float32)
    br = jax.random.uniform(keys[12], (M,), minval=-bw, maxval=bw, dtype=jnp.float32)
    bh = jax.random.uniform(keys[13], (M,), minval=-bw, maxval=bw, dtype=jnp.float32)
    log_beta = jnp.log(jnp.float32(1.0))        # LearnedSoftPlus(init_beta=1.0)

    # Hoisted one-time prep (reusable across timesteps), f32 matmuls to match torch.
    params = prepare_dgm_params(Uz, Ug, Ur, Uh, Wz, Wg, Wr, Wh,
                                bz, bg, br, bh, log_beta, matmul_dtype=None)
    S_new, X_out = dgm_cell_forward_prepared(S, X, *params, growing=growing)
    S_new = jax.block_until_ready(S_new)

    # Pure-JAX reference (matches the torch forward).
    beta_ref = jnp.exp(log_beta)

    def sp(v):
        bv = beta_ref * v
        return jnp.where(bv < 20.0, jnp.log1p(jnp.exp(bv)) / beta_ref, v)

    Z = sp(X @ Uz.T + S @ Wz.T + bz)
    G = sp(X @ Ug.T + S @ Wg.T + bg)
    R = sp(X @ Ur.T + S @ Wr.T + br)
    H = X @ Uh.T + (S * R) @ Wh.T + bh
    if not growing:
        H = sp(H)
    S_ref = (1.0 - G) * H + Z * S

    assert S_new.shape == (batch, seq, M), S_new.shape
    assert jnp.allclose(S_new, S_ref, atol=1e-5, rtol=1e-5), \
        float(jnp.max(jnp.abs(S_new - S_ref)))
    assert jnp.array_equal(X_out, X)

    print("KERNEL_OK")
</pallas_src>

<mosaic_0001>
module attributes {stable_mosaic.version = 11 : i64} {
  func.func @_dgm_cell_kernel(%arg0: i32, %arg1: memref<1x2xf32, #tpu.memory_space<smem>>, %arg2: memref<16x32xf32, #tpu.memory_space<vmem>>, %arg3: memref<16x32xf32, #tpu.memory_space<vmem>>, %arg4: memref<32x128xf32, #tpu.memory_space<vmem>>, %arg5: memref<32x128xf32, #tpu.memory_space<vmem>>, %arg6: memref<32x32xf32, #tpu.memory_space<vmem>>, %arg7: memref<1x128xf32, #tpu.memory_space<vmem>>, %arg8: memref<16x32xf32, #tpu.memory_space<vmem>>) attributes {dimension_semantics = [#tpu.dimension_semantics<parallel>], iteration_bounds = array<i64: 1>, scalar_prefetch = 0 : i64, scratch_operands = 0 : i64, tpu.core_type = #tpu.core_type<tc>, window_params = [{transform_indices = @transform_0, window_bounds = array<i64: 1, 2>}, {transform_indices = @transform_1, window_bounds = array<i64: 16, 32>}, {transform_indices = @transform_2, window_bounds = array<i64: 16, 32>}, {pipeline_mode = #tpu.pipeline_mode<synchronous>, transform_indices = @transform_3, window_bounds = array<i64: 32, 128>}, {pipeline_mode = #tpu.pipeline_mode<synchronous>, transform_indices = @transform_4, window_bounds = array<i64: 32, 128>}, {pipeline_mode = #tpu.pipeline_mode<synchronous>, transform_indices = @transform_5, window_bounds = array<i64: 32, 32>}, {pipeline_mode = #tpu.pipeline_mode<synchronous>, transform_indices = @transform_6, window_bounds = array<i64: 1, 128>}, {transform_indices = @transform_7, window_bounds = array<i64: 16, 32>}]} {
    %c0 = arith.constant 0 : index
    %c0_0 = arith.constant 0 : index
    %0 = memref.load %arg1[%c0, %c0_0] : memref<1x2xf32, #tpu.memory_space<smem>>
    %c0_1 = arith.constant 0 : index
    %c1 = arith.constant 1 : index
    %1 = memref.load %arg1[%c0_1, %c1] : memref<1x2xf32, #tpu.memory_space<smem>>
    %c0_2 = arith.constant 0 : index
    %c0_3 = arith.constant 0 : index
    %2 = vector.load %arg2[%c0_2, %c0_3] : memref<16x32xf32, #tpu.memory_space<vmem>>, vector<16x32xf32>
    %c0_4 = arith.constant 0 : index
    %c0_5 = arith.constant 0 : index
    %3 = vector.load %arg3[%c0_4, %c0_5] : memref<16x32xf32, #tpu.memory_space<vmem>>, vector<16x32xf32>
    %c0_6 = arith.constant 0 : index
    %c0_7 = arith.constant 0 : index
    %4 = vector.load %arg3[%c0_6, %c0_7] : memref<16x32xf32, #tpu.memory_space<vmem>>, vector<16x32xf32>
    %c0_8 = arith.constant 0 : index
    %c0_9 = arith.constant 0 : index
    %5 = vector.load %arg4[%c0_8, %c0_9] : memref<32x128xf32, #tpu.memory_space<vmem>>, vector<32x128xf32>
    %cst = arith.constant dense<0.000000e+00> : vector<16x128xf32>
    %6 = tpu.matmul %2, %5, %cst {dimension_numbers = #tpu.dot_dimension_numbers<[1], [0], [0], [1], [0, 0, 1, 1], [], []>} : vector<16x32xf32>, vector<32x128xf32>, vector<16x128xf32> -> vector<16x128xf32>
    %c0_10 = arith.constant 0 : index
    %c0_11 = arith.constant 0 : index
    %7 = vector.load %arg5[%c0_10, %c0_11] : memref<32x128xf32, #tpu.memory_space<vmem>>, vector<32x128xf32>
    %cst_12 = arith.constant dense<0.000000e+00> : vector<16x128xf32>
    %8 = tpu.matmul %4, %7, %cst_12 {dimension_numbers = #tpu.dot_dimension_numbers<[1], [0], [0], [1], [0, 0, 1, 1], [], []>} : vector<16x32xf32>, vector<32x128xf32>, vector<16x128xf32> -> vector<16x128xf32>
    %9 = arith.addf %6, %8 : vector<16x128xf32>
    %c0_13 = arith.constant 0 : index
    %c0_14 = arith.constant 0 : index
    %10 = vector.load %arg7[%c0_13, %c0_14] : memref<1x128xf32, #tpu.memory_space<vmem>>, vector<1x128xf32>
    %11 = vector.broadcast %10 : vector<1x128xf32> to vector<16x128xf32>
    %12 = arith.addf %9, %11 : vector<16x128xf32>
    %13 = vector.extract_strided_slice %12 {offsets = [0, 0], sizes = [16, 32], strides = [1, 1]} : vector<16x128xf32> to vector<16x32xf32>
    %14 = vector.broadcast %0 : f32 to vector<16x32xf32>
    %15 = arith.mulf %14, %13 : vector<16x32xf32>
    %cst_15 = arith.constant 2.000000e+01 : f32
    %16 = vector.broadcast %cst_15 : f32 to vector<16x32xf32>
    %17 = arith.cmpf olt, %15, %16 : vector<16x32xf32>
    %18 = math.exp %15 : vector<16x32xf32>
    %19 = math.log1p %18 : vector<16x32xf32>
    %20 = vector.broadcast %1 : f32 to vector<16x32xf32>
    %21 = arith.mulf %19, %20 : vector<16x32xf32>
    %22 = arith.select %17, %21, %13 : vector<16x32xi1>, vector<16x32xf32>
    %23 = vector.extract_strided_slice %12 {offsets = [0, 32], sizes = [16, 32], strides = [1, 1]} : vector<16x128xf32> to vector<16x32xf32>
    %24 = vector.broadcast %0 : f32 to vector<16x32xf32>
    %25 = arith.mulf %24, %23 : vector<16x32xf32>
    %cst_16 = arith.constant 2.000000e+01 : f32
    %26 = vector.broadcast %cst_16 : f32 to vector<16x32xf32>
    %27 = arith.cmpf olt, %25, %26 : vector<16x32xf32>
    %28 = math.exp %25 : vector<16x32xf32>
    %29 = math.log1p %28 : vector<16x32xf32>
    %30 = vector.broadcast %1 : f32 to vector<16x32xf32>
    %31 = arith.mulf %29, %30 : vector<16x32xf32>
    %32 = arith.select %27, %31, %23 : vector<16x32xi1>, vector<16x32xf32>
    %33 = vector.extract_strided_slice %12 {offsets = [0, 64], sizes = [16, 32], strides = [1, 1]} : vector<16x128xf32> to vector<16x32xf32>
    %34 = vector.broadcast %0 : f32 to vector<16x32xf32>
    %35 = arith.mulf %34, %33 : vector<16x32xf32>
    %cst_17 = arith.constant 2.000000e+01 : f32
    %36 = vector.broadcast %cst_17 : f32 to vector<16x32xf32>
    %37 = arith.cmpf olt, %35, %36 : vector<16x32xf32>
    %38 = math.exp %35 : vector<16x32xf32>
    %39 = math.log1p %38 : vector<16x32xf32>
    %40 = vector.broadcast %1 : f32 to vector<16x32xf32>
    %41 = arith.mulf %39, %40 : vector<16x32xf32>
    %42 = arith.select %37, %41, %33 : vector<16x32xi1>, vector<16x32xf32>
    %43 = vector.extract_strided_slice %12 {offsets = [0, 96], sizes = [16, 32], strides = [1, 1]} : vector<16x128xf32> to vector<16x32xf32>
    %44 = arith.mulf %3, %42 : vector<16x32xf32>
    %c0_18 = arith.constant 0 : index
    %c0_19 = arith.constant 0 : index
    %45 = vector.load %arg6[%c0_18, %c0_19] : memref<32x32xf32, #tpu.memory_space<vmem>>, vector<32x32xf32>
    %cst_20 = arith.constant dense<0.000000e+00> : vector<16x32xf32>
    %46 = tpu.matmul %44, %45, %cst_20 {dimension_numbers = #tpu.dot_dimension_numbers<[1], [0], [0], [1], [0, 0, 1, 1], [], []>} : vector<16x32xf32>, vector<32x32xf32>, vector<16x32xf32> -> vector<16x32xf32>
    %47 = arith.addf %43, %46 : vector<16x32xf32>
    %48 = vector.broadcast %0 : f32 to vector<16x32xf32>
    %49 = arith.mulf %48, %47 : vector<16x32xf32>
    %cst_21 = arith.constant 2.000000e+01 : f32
    %50 = vector.broadcast %cst_21 : f32 to vector<16x32xf32>
    %51 = arith.cmpf olt, %49, %50 : vector<16x32xf32>
    %52 = math.exp %49 : vector<16x32xf32>
    %53 = math.log1p %52 : vector<16x32xf32>
    %54 = vector.broadcast %1 : f32 to vector<16x32xf32>
    %55 = arith.mulf %53, %54 : vector<16x32xf32>
    %56 = arith.select %51, %55, %47 : vector<16x32xi1>, vector<16x32xf32>
    %cst_22 = arith.constant 1.000000e+00 : f32
    %57 = vector.broadcast %cst_22 : f32 to vector<16x32xf32>
    %58 = arith.subf %57, %32 : vector<16x32xf32>
    %59 = arith.mulf %58, %56 : vector<16x32xf32>
    %60 = arith.mulf %22, %3 : vector<16x32xf32>
    %61 = arith.addf %59, %60 : vector<16x32xf32>
    %c0_23 = arith.constant 0 : index
    %c0_24 = arith.constant 0 : index
    %62 = vector.load %arg8[%c0_23, %c0_24] : memref<16x32xf32, #tpu.memory_space<vmem>>, vector<16x32xf32>
    tpu.vector_store %arg8[%c0_23, %c0_24], %61 {strides = array<i32>} : memref<16x32xf32, #tpu.memory_space<vmem>>, vector<16x32xf32>,
    return
  }
  func.func @transform_0(%arg0: i32) -> (i32, i32) {
    %c0_i32 = arith.constant 0 : i32
    %c0_i32_0 = arith.constant 0 : i32
    %c0_i32_1 = arith.constant 0 : i32
    return %c0_i32, %c0_i32_0 : i32, i32
  }
  func.func @transform_1(%arg0: i32) -> (i32, i32) {
    %c0_i32 = arith.constant 0 : i32
    %c0_i32_0 = arith.constant 0 : i32
    return %arg0, %c0_i32 : i32, i32
  }
  func.func @transform_2(%arg0: i32) -> (i32, i32) {
    %c0_i32 = arith.constant 0 : i32
    %c0_i32_0 = arith.constant 0 : i32
    return %arg0, %c0_i32 : i32, i32
  }
  func.func @transform_3(%arg0: i32) -> (i32, i32) {
    %c0_i32 = arith.constant 0 : i32
    %c0_i32_0 = arith.constant 0 : i32
    %c0_i32_1 = arith.constant 0 : i32
    return %c0_i32, %c0_i32_0 : i32, i32
  }
  func.func @transform_4(%arg0: i32) -> (i32, i32) {
    %c0_i32 = arith.constant 0 : i32
    %c0_i32_0 = arith.constant 0 : i32
    %c0_i32_1 = arith.constant 0 : i32
    return %c0_i32, %c0_i32_0 : i32, i32
  }
  func.func @transform_5(%arg0: i32) -> (i32, i32) {
    %c0_i32 = arith.constant 0 : i32
    %c0_i32_0 = arith.constant 0 : i32
    %c0_i32_1 = arith.constant 0 : i32
    return %c0_i32, %c0_i32_0 : i32, i32
  }
  func.func @transform_6(%arg0: i32) -> (i32, i32) {
    %c0_i32 = arith.constant 0 : i32
    %c0_i32_0 = arith.constant 0 : i32
    %c0_i32_1 = arith.constant 0 : i32
    return %c0_i32, %c0_i32_0 : i32, i32
  }
  func.func @transform_7(%arg0: i32) -> (i32, i32) {
    %c0_i32 = arith.constant 0 : i32
    %c0_i32_0 = arith.constant 0 : i32
    return %arg0, %c0_i32 : i32, i32
  }
}

</mosaic_0001>

<bundles_post_ra>
// kernel: dgm_cell_forward_prepared.1
= control target key start
LH: loop header
LB: loop body
LE: loop exit
PB: predicated region body
PF: predicated region fallthrough
CT: control target
= control target key end

     0   :  { %12 = vsyncpa [#allocation5], 0  ;;  %s944_s0 = inlined_call_operand.vmem [shape: f32[1,2], index: 0, kind: input, shape index: {}]   ;;  %s945_s1 = inlined_call_operand.vmem [shape: f32[16,32], index: 1, kind: input, shape index: {}]   ;;  %s946_s2 = inlined_call_operand.hbm [shape: f32[16,32], index: 2, kind: input, shape index: {}]   ;;  %s947_s3 = inlined_call_operand.hbm [shape: f32[32,128], index: 3, kind: input, shape index: {}]   ;;  %s948_s4 = inlined_call_operand.hbm [shape: f32[32,128], index: 4, kind: input, shape index: {}]   ;;  %s949_s5 = inlined_call_operand.hbm [shape: f32[32,32], index: 5, kind: input, shape index: {}]   ;;  %s950_s6 = inlined_call_operand.vmem [shape: f32[1,128], index: 6, kind: input, shape index: {}]   ;;  %s951_s7 = inlined_call_operand.hbm [shape: f32[16,32], index: 7, kind: output, shape index: {}]  }
   0x1   :  { %13 = vsyncpa [#allocation3], 0 }
   0x2   :  { %14 = vsyncpa [#allocation8], 0 }
   0x3   :  { %15 = vsyncpa [#allocation11], 0 }
   0x4   :  { %16 = vsyncpa [#allocation4], 0  ;;  %s23_s26 = sshll.u32 %s944_s0, 4  ;;  %s746_s27 = smov [#allocation7]   ;;  %s24_s26 = int_to_ptr.vmem [resolvable:$true] %s23_s26 }
   0x5   :  { %s46_s28 = sshll.u32 %s746_s27, 4  ;;  %s614_s8 = scalar_lea.hbm %s947_s3, 512  ;;  %s47_s28 = int_to_ptr.vmem [resolvable:$true] %s46_s28 }
   0x6   :  { %p615_p0 = scmp.ne.s32.totalorder %s947_s3, %s614_s8  ;;  %p618_p1 = scmp.lt.u32.totalorder %s614_s8, %s947_s3 }
   0x8   :  { %p620_p2 = pnand %p618_p1, %p615_p0 }
   0xa   :  { %623 = shalt.err (!%p620_p2)
}
   0xb   :  { %s624_s13 = scalar_lea.vmem %s47_s28, 512  ;;  %p629_p4 = scmp.lt.s32.totalorder %s47_s28, %s47_s28 }
   0xc   :  { %p625_p3 = scmp.ne.s32.totalorder %s47_s28, %s624_s13  ;;  %p630_p5 = scmp.lt.s32.totalorder %s624_s13, %s624_s13 }
   0xe   :  { %p631_p6 = por %p630_p5, %p629_p4 }
  0x10   :  { %p632_p7 = pnand %p631_p6, %p625_p3 }
  0x12   :  { %635 = shalt.err (!%p632_p7)
}
  0x13   :  { %s747_s0 = smov 128   ;;  %s748_s14 = smov 8  }
  0x14   :  { %52 = dma.hbm_to_vmem [thread:$0]  %s947_s3, 512, %s47_s28, [#allocation8], %s747_s0, %s747_s0, %s748_s14  }
  0x15   :  { %s636_s17 = scalar_lea.vmem %s24_s26, 16  ;;  %p641_p9 = scmp.lt.s32.totalorder %s24_s26, %s24_s26 }
  0x16   :  { %p637_p8 = scmp.ne.s32.totalorder %s24_s26, %s636_s17  ;;  %p642_p10 = scmp.lt.s32.totalorder %s636_s17, %s636_s17 }
  0x18   :  { %p643_p11 = por %p642_p10, %p641_p9 }
  0x1a   :  { %p644_p12 = pnand %p643_p11, %p637_p8 }
  0x1c   :  { %647 = shalt.err (!%p644_p12)
}
  0x1d   :  { %s749_s18 = smov [#allocation2]   ;;  %s750_s19 = smov [#allocation6]  }
  0x1e   :  { %26 = dma.vmem_to_smem %s24_s26, 16, %s749_s18, [#allocation5]  }
  0x1f   :  { %s34_s20 = sshll.u32 %s750_s19, 4  ;;  %s751_s21 = smov [#allocation9]   ;;  %s35_s20 = int_to_ptr.vmem [resolvable:$true] %s34_s20 }
  0x20   :  { %s58_s22 = sshll.u32 %s751_s21, 4  ;;  %s648_s3 = scalar_lea.hbm %s946_s2, 256  ;;  %s815_s22 = int_to_ptr.vmem [resolvable:$true] %s58_s22 }
  0x21   :  { %p649_p13 = scmp.ne.s32.totalorder %s946_s2, %s648_s3  ;;  %p652_p0 = scmp.lt.u32.totalorder %s648_s3, %s946_s2 }
  0x23   :  { %p654_p1 = pnand %p652_p0, %p649_p13 }
  0x25   :  { %657 = shalt.err (!%p654_p1)
}
  0x26   :  { %s658_s26 = scalar_lea.vmem %s35_s20, 256  ;;  %p663_p3 = scmp.lt.s32.totalorder %s35_s20, %s35_s20 }
  0x27   :  { %p659_p2 = scmp.ne.s32.totalorder %s35_s20, %s658_s26  ;;  %p664_p4 = scmp.lt.s32.totalorder %s658_s26, %s658_s26 }
  0x29   :  { %p665_p5 = por %p664_p4, %p663_p3 }
  0x2b   :  { %p666_p6 = pnand %p665_p5, %p659_p2 }
  0x2d   :  { %669 = shalt.err (!%p666_p6)
}
  0x2e   :  { %40 = dma.hbm_to_vmem [thread:$0]  %s946_s2, 256, %s35_s20, [#allocation3], %s747_s0, %s747_s0, %s748_s14  }
  0x2f   :  { %s670_s11 = scalar_lea.hbm %s948_s4, 512 }
  0x30   :  { %p671_p7 = scmp.ne.s32.totalorder %s948_s4, %s670_s11  ;;  %p674_p8 = scmp.lt.u32.totalorder %s670_s11, %s948_s4 }
  0x32   :  { %p676_p9 = pnand %p674_p8, %p671_p7 }
  0x34   :  { %679 = shalt.err (!%p676_p9)
}
  0x35   :  { %s680_s17 = scalar_lea.vmem %s815_s22, 512  ;;  %p685_p11 = scmp.lt.s32.totalorder %s815_s22, %s815_s22 }
  0x36   :  { %p681_p10 = scmp.ne.s32.totalorder %s815_s22, %s680_s17  ;;  %p686_p12 = scmp.lt.s32.totalorder %s680_s17, %s680_s17 }
  0x38   :  { %p687_p13 = por %p686_p12, %p685_p11 }
  0x3a   :  { %p688_p0 = pnand %p687_p13, %p681_p10 }
  0x3c   :  { %691 = shalt.err (!%p688_p0)
}
  0x3d   :  { %64 = dma.hbm_to_vmem [thread:$0]  %s948_s4, 512, %s815_s22, [#allocation8], %s747_s0, %s747_s0, %s748_s14  }
  0x3e   :  { %s752_s19 = smov [#allocation10]   ;;  %s692_s24 = scalar_lea.hbm %s949_s5, 512 }
  0x3f   :  { %s70_s20 = sshll.u32 %s752_s19, 4  ;;  %p693_p1 = scmp.ne.s32.totalorder %s949_s5, %s692_s24  ;;  %s71_s20 = int_to_ptr.vmem [resolvable:$true] %s70_s20 }
  0x40   :  { %p696_p2 = scmp.lt.u32.totalorder %s692_s24, %s949_s5 }
  0x42   :  { %p698_p3 = pnand %p696_p2, %p693_p1 }
  0x44   :  { %701 = shalt.err (!%p698_p3)
}
  0x45   :  { %s702_s29 = scalar_lea.vmem %s71_s20, 512  ;;  %p707_p5 = scmp.lt.s32.totalorder %s71_s20, %s71_s20 }
  0x46   :  { %p703_p4 = scmp.ne.s32.totalorder %s71_s20, %s702_s29  ;;  %p708_p6 = scmp.lt.s32.totalorder %s702_s29, %s702_s29 }
  0x48   :  { %p709_p7 = por %p708_p6, %p707_p5 }
  0x4a   :  { %p710_p8 = pnand %p709_p7, %p703_p4 }
  0x4c   :  { %713 = shalt.err (!%p710_p8)
}
  0x4d   :  { %76 = dma.hbm_to_vmem [thread:$0]  %s949_s5, 512, %s71_s20, [#allocation11], %s747_s0, %s747_s0, %s748_s14  }
  0x4e   :  { %736 = dma.done.wait [#allocation5], 16  }
  0x4f   :  { %737 = vsyncadd [#allocation5], 4294967280 }
  0x50   :  { %738 = dma.done.wait [#allocation3], 256  }
  0x51   :  { %739 = vsyncadd [#allocation3], 4294967040 }
  0x52   :  { %740 = dma.done.wait [#allocation8], 1024  }
  0x53   :  { %741 = vsyncadd [#allocation8], 4294966272 }
  0x54   :  { %742 = dma.done.wait [#allocation11], 512  }
  0x55   :  { %743 = vsyncadd [#allocation11], 4294966784 }
  0x56   :  { %94 = sfence }
  0x57   :  { %v105_v0 = vld [vmem:[#allocation9] sm:$0xff]  ;;  %v106_v1 = vld [vmem:[#allocation9 + $0x8] sm:$0xff]  ;;  %v107_v2 = vld [vmem:[#allocation9 + $0x10] sm:$0xff]  ;;  %vm109_vm0 = vcmask 261120   ;;  %s95_s9 = sld [smem:[#allocation2]]  ;;  %s754_s12 = smov 96  }
  0x58   :  { %v561_v3 = vpack.c.bf16 %v106_v1, %v105_v0  ;;  %v108_v4 = vld [vmem:[#allocation9 + $0x18] sm:$0xff]  ;;  %v867_v5 = vld [vmem:[#allocation6] sm:$0xff]  ;;  %v101_v7 = vld [vmem:[#allocation7] sm:$0xff]  ;;  %s755_s13 = smov 32   ;;  %s756_s15 = smov [#allocation12]  }
  0x59   :  { %v565_v6 = vpack.c.bf16 %v108_v4, %v107_v2  ;;  %536 = vmatprep.mubr.msk.f32.mxu0 %vm109_vm0, %v867_v5  ;;  %v102_v8 = vld [vmem:[#allocation7 + $0x8] sm:$0xff]  ;;  %v103_v10 = vld [vmem:[#allocation7 + $0x10] sm:$0xff]  ;;  %v104_v11 = vld [vmem:[#allocation7 + $0x18] sm:$0xff]  ;;  %s487_s16 = sshll.u32 %s756_s15, 4  ;;  %s488_s16 = int_to_ptr.vmem [resolvable:$true] %s487_s16 }
  0x5a   :  { %562 = vmatprep.subr.bf16.mxu0 %v561_v3  ;;  %v569_v9 = vpack.c.bf16 %v102_v8, %v101_v7  ;;  %v871_v12 = vld [vmem:[#allocation6 + $0x8] sm:$0xff]  ;;  %v573_v13 = vpack.c.bf16 %v104_v11, %v103_v10  ;;  %v97_v14 = vld [vmem:[%s945_s1] sm:$0xff]  ;;  %v323_v16 = vld [vmem:[#allocation10] sm:$0xff]  ;;  %s714_s17 = scalar_lea.vmem %s488_s16, 256  ;;  %p719_p10 = scmp.lt.s32.totalorder %s488_s16, %s488_s16 }
  0x5b   :  { %564 = vmatpush3.bf16.msra.mxu0 %v561_v3  ;;  %v98_v15 = vld [vmem:[%s945_s1 + $0x8] sm:$0xff]  ;;  %v324_v17 = vld [vmem:[#allocation10 + $0x8] sm:$0xff]  ;;  %v507_v19 = vld [vmem:[%s950_s6] ss:$0 sm:$0xff]  ;;  %s502_s1 = sld [smem:[#allocation2 + $0x1]]  ;;  %s753_s6 = smov 64  }
  0x5c   :  { %566 = vmatprep.subr.bf16.mxu0 %v565_v6  ;;  %v577_v18 = vpack.c.bf16 %v324_v17, %v323_v16  ;;  %v325_v35 = vld [vmem:[#allocation10 + $0x10] sm:$0xff]  ;;  %v326_v36 = vld [vmem:[#allocation10 + $0x18] sm:$0xff]  ;;  %p715_p9 = scmp.ne.s32.totalorder %s488_s16, %s714_s17  ;;  %p720_p11 = scmp.lt.s32.totalorder %s714_s17, %s714_s17 }
  0x5d   :  { %v886_v21 = vstv %s95_s9  ;;  %v581_v37 = vpack.c.bf16 %v326_v36, %v325_v35 }
  0x5e   :  { %578 = vmatprep.subr.bf16.mxu1 %v577_v18  ;;  %p721_p12 = por %p720_p11, %p719_p10 }
  0x5f   :  { %568 = vmatpush3.bf16.msra.mxu0 %v565_v6  ;;  %580 = vmatpush3.bf16.msra.mxu1 %v577_v18 }
  0x60   :  { %570 = vmatprep.subr.bf16.mxu0 %v569_v9  ;;  %582 = vmatprep.subr.bf16.mxu1 %v581_v37  ;;  %p722_p13 = pnand %p721_p12, %p715_p9 }
  0x61   :  { %v893_v47 = vstv %s502_s1 }
  0x62   :  { %537 = vmatmul.mubr.msk.f32.vlgmr.msra.gmra.mrb[0].mxu0 %vm109_vm0, %v871_v12 }
  0x63   :  { %572 = vmatpush3.bf16.msra.mxu0 %v569_v9  ;;  %547 = vmatprep.mubr.msk.f32.mxu0 %vm109_vm0, %v97_v14 }
  0x64   :  { %574 = vmatprep.subr.bf16.mxu0 %v573_v13  ;;  %584 = vmatpush3.bf16.msra.mxu1 %v581_v37 }
  0x67   :  { %576 = vmatpush3.bf16.msra.mxu0 %v573_v13 }
  0x6a   :  { %548 = vmatmul.mubr.msk.f32.vlgmr.msra.gmra.mrb[0].mxu0 %vm109_vm0, %v98_v15 }
 0x13d   :  { %v549_v20 = vpop.f32.mrb[0].mxu0 }
 0x13e   :  { %v888_v22 = vadd.f32 %v549_v20, %v507_v19  ;;  %v263_v23 = vpop.f32.mrb[1].mxu0 }
 0x13f   :  { %v279_v24 = vadd.f32 %v507_v19, %v263_v23 }
 0x140   :  { %v283_v25 = vmul.f32 %v886_v21, %v888_v22 }
 0x141   :  { %v282_v26 = vmul.f32 %v886_v21, %v279_v24 }
 0x142   :  { %v288_v27 = vmul.f32 1.442695, %v283_v25  ;;  %vm285_vm4 = vcmp.lt.f32.partialorder %v283_v25, 20.0 }
 0x143   :  { %v286_v28 = vmul.f32 1.442695, %v282_v26  ;;  %vm284_vm3 = vcmp.lt.f32.partialorder %v282_v26, 20.0 }
 0x144   :  { %598 = vpow2.f32 %v288_v27 }
 0x145   :  { %600 = vpow2.f32 %v286_v28 }
 0x14e   :  { %v599_v29 = vpop.eup %598 }
 0x14f   :  { %v601_v30 = vpop.eup %600  ;;  %v299_v31 = vadd.f32 1.0, %v599_v29  ;;  %v302_v34 = vmul.f32 -0.5, %v599_v29  ;;  %v305_v41 = vand.u32 2147483647, %v599_v29 }
 0x150   :  { %v290_v32 = vadd.f32 1.0, %v601_v30  ;;  %v293_v33 = vmul.f32 -0.5, %v601_v30  ;;  %v296_v40 = vand.u32 2147483647, %v601_v30 }
 0x151   :  { %602 = vlog2.f32 %v299_v31  ;;  %v303_v39 = vadd.f32 1.0, %v302_v34  ;;  %vm306_vm2 = vcmp.lt.f32.partialorder %v305_v41, 0.0004427343 }
 0x152   :  { %604 = vlog2.f32 %v290_v32  ;;  %v294_v38 = vadd.f32 1.0, %v293_v33  ;;  %vm297_vm1 = vcmp.lt.f32.partialorder %v296_v40, 0.0004427343 }
 0x153   :  { %v304_v48 = vmul.f32 %v599_v29, %v303_v39 }
 0x154   :  { %v295_v46 = vmul.f32 %v601_v30, %v294_v38 }
 0x15b   :  { %v603_v42 = vpop.eup %602 }
 0x15c   :  { %v605_v43 = vpop.eup %604  ;;  %v301_v44 = vmul.f32 0.6931472, %v603_v42 }
 0x15d   :  { %v292_v45 = vmul.f32 0.6931472, %v605_v43 }
 0x15e   :  { %v307_v50 = vsel %vm306_vm2, %v304_v48, %v301_v44 }
 0x15f   :  { %v298_v49 = vsel %vm297_vm1, %v295_v46, %v292_v45  ;;  %v310_v53 = vmul.f32 %v893_v47, %v307_v50 }
 0x160   :  { %v309_v51 = vmul.f32 %v893_v47, %v298_v49 }
 0x161   :  { %v902_v54 = vsel %vm285_vm4, %v310_v53, %v888_v22 }
 0x162   :  { %v896_v52 = vsel %vm284_vm3, %v309_v51, %v279_v24  ;;  %v461_v30 = vmul.f32 %v902_v54, %v871_v12  ;;  %v449_v36 = vsub.f32 1.0, %v902_v54 }
 0x163   :  { %315 = vrot.lane.b32.xlu0 %v896_v52, %s753_s6  ;;  %v460_v28 = vmul.f32 %v896_v52, %v867_v5  ;;  %v448_v32 = vsub.f32 1.0, %v896_v52 }
 0x167   :  { %317 = vrot.lane.b32.xlu0 %v902_v54, %s753_s6 }
 0x1d5   :  { %v316_v55 = vpop.permute.xlu0 %315 }
 0x1d6   :  { %v321_v56 = vmul.f32 %v316_v55, %v867_v5 }
 0x1d8   :  { %558 = vmatprep.mubr.msk.f32.mxu1 %vm109_vm0, %v321_v56 }
 0x1d9   :  { %v318_v57 = vpop.permute.xlu0 %317 }
 0x1da   :  { %v322_v58 = vmul.f32 %v318_v57, %v871_v12 }
 0x1dc   :  { %559 = vmatmul.mubr.msk.f32.vlgmr.msra.gmra.mrb[0].mxu1 %vm109_vm0, %v322_v58 }
 0x2af   :  { %v560_v59 = vpop.f32.mrb[0].mxu1 }
 0x2b0   :  { %v399_v60 = vpop.f32.mrb[1].mxu1 }
 0x2b1   :  { %410 = vrot.lane.b32.xlu1 %v399_v60, %s754_s12 }
 0x2b5   :  { %412 = vrot.lane.b32.xlu1 %v560_v59, %s754_s12 }
 0x323   :  { %v411_v61 = vpop.permute.xlu1 %410 }
 0x324   :  { %v416_v62 = vadd.f32 %v411_v61, %v279_v24 }
 0x326   :  { %v418_v63 = vmul.f32 %v416_v62, %v886_v21 }
 0x327   :  { %v413_v0 = vpop.permute.xlu1 %412 }
 0x328   :  { %v422_v1 = vmul.f32 1.442695, %v418_v63  ;;  %v417_v2 = vadd.f32 %v413_v0, %v888_v22  ;;  %vm420_vm6 = vcmp.lt.f32.partialorder %v418_v63, 20.0 }
 0x32a   :  { %606 = vpow2.f32 %v422_v1  ;;  %v419_v3 = vmul.f32 %v417_v2, %v886_v21 }
 0x32c   :  { %v424_v4 = vmul.f32 1.442695, %v419_v3  ;;  %vm421_vm8 = vcmp.lt.f32.partialorder %v419_v3, 20.0 }
 0x32e   :  { %608 = vpow2.f32 %v424_v4 }
 0x334   :  { %v607_v6 = vpop.eup %606 }
 0x335   :  { %v426_v7 = vadd.f32 1.0, %v607_v6  ;;  %v429_v10 = vmul.f32 -0.5, %v607_v6  ;;  %v432_v14 = vand.u32 2147483647, %v607_v6 }
 0x337   :  { %610 = vlog2.f32 %v426_v7  ;;  %v430_v11 = vadd.f32 1.0, %v429_v10  ;;  %vm433_vm5 = vcmp.lt.f32.partialorder %v432_v14, 0.0004427343 }
 0x338   :  { %v609_v8 = vpop.eup %608 }
 0x339   :  { %v435_v9 = vadd.f32 1.0, %v609_v8  ;;  %v438_v13 = vmul.f32 -0.5, %v609_v8  ;;  %v431_v17 = vmul.f32 %v607_v6, %v430_v11  ;;  %v441_v19 = vand.u32 2147483647, %v609_v8 }
 0x33b   :  { %612 = vlog2.f32 %v435_v9  ;;  %v439_v18 = vadd.f32 1.0, %v438_v13  ;;  %vm442_vm7 = vcmp.lt.f32.partialorder %v441_v19, 0.0004427343 }
 0x33d   :  { %v440_v24 = vmul.f32 %v609_v8, %v439_v18 }
 0x341   :  { %v611_v15 = vpop.eup %610 }
 0x342   :  { %v428_v16 = vmul.f32 0.6931472, %v611_v15 }
 0x344   :  { %v434_v20 = vsel %vm433_vm5, %v431_v17, %v428_v16 }
 0x345   :  { %v613_v21 = vpop.eup %612  ;;  %v444_v22 = vmul.f32 %v434_v20, %v893_v47 }
 0x346   :  { %v437_v23 = vmul.f32 0.6931472, %v613_v21 }
 0x347   :  { %v446_v25 = vsel %vm420_vm6, %v444_v22, %v416_v62 }
 0x348   :  { %452 = vrot.lane.b32.xlu0 %v446_v25, %s753_s6  ;;  %v443_v26 = vsel %vm442_vm7, %v440_v24, %v437_v23 }
 0x349   :  { %v445_v27 = vmul.f32 %v443_v26, %v893_v47 }
 0x34b   :  { %v447_v29 = vsel %vm421_vm8, %v445_v27, %v417_v2 }
 0x34c   :  { %454 = vrot.lane.b32.xlu1 %v447_v29, %s753_s6  ;;  %464 = vrot.lane.b32.xlu0 %v460_v28, %s755_s13 }
 0x350   :  { %466 = vrot.lane.b32.xlu1 %v461_v30, %s755_s13 }
 0x3ba   :  { %v453_v31 = vpop.permute.xlu0 %452 }
 0x3bb   :  { %v458_v33 = vmul.f32 %v453_v31, %v448_v32 }
 0x3be   :  { %v455_v34 = vpop.permute.xlu1 %454  ;;  %v465_v35 = vpop.permute.xlu0 %464 }
 0x3bf   :  { %v470_v37 = vadd.f32 %v465_v35, %v458_v33  ;;  %v459_v38 = vmul.f32 %v455_v34, %v449_v36 }
 0x3c1   :  { %474 = vrot.lane.b32.xlu0 %v470_v37, %s754_s12 }
 0x3c2   :  { %v467_v5 = vpop.permute.xlu1 %466 }
 0x3c3   :  { %v471_v39 = vadd.f32 %v467_v5, %v459_v38 }
 0x3c5   :  { %476 = vrot.lane.b32.xlu1 %v471_v39, %s754_s12 }
 0x433   :  { %v475_v40 = vpop.permute.xlu0 %474 }
 0x434   :  { %480 = vst.msk [vmem:[#allocation12] sm:$0xff] %vm109_vm0, %v475_v40 }
 0x437   :  { %v477_v12 = vpop.permute.xlu1 %476 }
 0x438   :  { %481 = vst.msk [vmem:[#allocation12 + $0x8] sm:$0xff] %vm109_vm0, %v477_v12 }
 0x439   :  { %725 = shalt.err (!%p722_p13)
}
 0x43a   :  { %s726_s19 = scalar_lea.hbm %s951_s7, 256 }
 0x43b   :  { %p727_p0 = scmp.ne.s32.totalorder %s951_s7, %s726_s19  ;;  %p730_p1 = scmp.lt.u32.totalorder %s726_s19, %s951_s7 }
 0x43d   :  { %p732_p2 = pnand %p730_p1, %p727_p0 }
 0x43f   :  { %735 = shalt.err (!%p732_p2)
}
 0x440   :  { %493 = dma.vmem_to_hbm [thread:$0]  %s488_s16, 256, %s951_s7, [#allocation4], %s747_s0, %s747_s0, %s748_s14  }
 0x441   :  { %744 = dma.done.wait [#allocation4], 256  }
 0x442   :  { %745 = vsyncadd [#allocation4], 4294967040 }
 0x443   :  { %497 = vsyncpa [#allocation3], 1 }
 0x444   :  { %498 = vsyncpa [#allocation8], 1 }
 0x445   :  { %499 = vsyncpa [#allocation11], 1 }
 0x446   :  { %500 = vsyncpa [#allocation4], 1 }
 0x447   :  { %501 = vsyncpa [#allocation5], 1 }

</bundles_post_ra>
